<compile_context>
chip_gen: v5e
topology: v5e:2x2
jax: 0.10.0
libtpu: 0.0.40
codegen_flags: <defaults>
</compile_context>

<pallas_src>
import jax
import jax.numpy as jnp
from jax.experimental import pallas as pl
from jax.experimental.pallas import tpu as pltpu


def temporal_attention_kernel(x_ref, w_ref, o_ref, m_sc, l_sc, acc_sc):
    """Processes one (t_tile, b_tile, H) slab of an online softmax over time."""
    t = pl.program_id(1)

    @pl.when(t == 0)
    def _init():
        m_sc[...] = jnp.full_like(m_sc, -jnp.inf)
        l_sc[...] = jnp.zeros_like(l_sc)
        acc_sc[...] = jnp.zeros_like(acc_sc)

    w = w_ref[...].astype(jnp.float32)                         # (1, H)

    # fc(x).squeeze(2): keepdims keeps the trailing size-1 lane dim so all the
    # softmax bookkeeping stays lane-aligned (no XLU relayouts).
    # (Linear bias omitted: exact no-op under softmax over the time axis.)
    scores = jnp.sum(x_ref[...] * w[None, :, :], axis=-1, keepdims=True)  # (Tt,Bt,1) f32

    m_prev = m_sc[...]                                         # (Bt, 1)
    m_new = jnp.maximum(m_prev, jnp.max(scores, axis=0))       # (Bt, 1)
    alpha = jnp.exp(m_prev - m_new)                            # (Bt, 1)
    p = jnp.exp(scores - m_new[None, :, :])                    # (Tt, Bt, 1)

    l_sc[...] = alpha * l_sc[...] + jnp.sum(p, axis=0)         # (Bt, 1)
    # Re-read the slab (VMEM loads are cheap) instead of pinning a long-lived
    # f32 copy; x stays in its native dtype, accumulation happens in f32.
    acc_sc[...] = alpha * acc_sc[...] + jnp.sum(p * x_ref[...], axis=0)   # (Bt, H)
    m_sc[...] = m_new

    @pl.when(t == pl.num_programs(1) - 1)
    def _finalize():
        o_ref[...] = (acc_sc[...] / l_sc[...]).astype(o_ref.dtype)


_SLAB_BUDGET_BYTES = 4 * 1024 * 1024  # per x input buffer (BlockSpec double-buffers)


def _sublane_multiple(dtype) -> int:
    itemsize = jnp.dtype(dtype).itemsize
    return {4: 8, 2: 16, 1: 32}.get(itemsize, 8)


def _choose_tiles(T, B, H, dtype):
    itemsize = jnp.dtype(dtype).itemsize
    sublane = _sublane_multiple(dtype)
    row_bytes = H * itemsize
    b_pad_min = -(-B // sublane) * sublane

    # Time tile: whole T if it fits the budget at the minimum batch tile,
    # otherwise the largest divisor of T that does (no time-axis padding).
    if T * row_bytes * sublane <= _SLAB_BUDGET_BYTES:
        t_tile = T
    else:
        t_tile = 1
        for d in range(T, 0, -1):
            if T % d == 0 and d * row_bytes * sublane <= _SLAB_BUDGET_BYTES:
                t_tile = d
                break

    # Batch tile: as big as the slab budget allows, sublane-aligned.
    b_cap = (_SLAB_BUDGET_BYTES // max(1, t_tile * row_bytes)) // sublane * sublane
    b_tile = max(sublane, min(max(sublane, b_cap), b_pad_min))
    # Keep >=2 batch grid steps when the batch allows it, so the "parallel"
    # axis can be sharded across v7x's two TensorCores (harmless on v5e/v6e).
    if b_pad_min >= 2 * sublane and b_tile > b_pad_min // 2:
        b_tile = max(sublane, (b_pad_min // 2) // sublane * sublane)
    return b_tile, t_tile


def temporal_attention(x, w, bias=None, *, b_tile=None, t_tile=None,
                       vmem_limit_bytes=32 * 1024 * 1024):
    """x: (T, B, H), w: (1, H), bias: (1,) [exact no-op under softmax] -> (B, H)."""
    del bias  # uniform shift of scores cancels exactly in softmax over T
    T, B, H = x.shape
    auto_b, auto_t = _choose_tiles(T, B, H, x.dtype)
    if b_tile is None:
        b_tile = auto_b
    if t_tile is None or T % t_tile != 0:
        t_tile = auto_t

    # Pad the batch up to a tile multiple: dense unmasked (b_tile, H) stores
    # and a pipelined multi-step grid (no grid=(1,) fallback).
    B_pad = -(-B // b_tile) * b_tile
    if B_pad != B:
        x = jnp.pad(x, ((0, 0), (0, B_pad - B), (0, 0)))

    grid = (B_pad // b_tile, T // t_tile)

    out = pl.pallas_call(
        temporal_attention_kernel,
        out_shape=jax.ShapeDtypeStruct((B_pad, H), x.dtype),
        grid=grid,
        in_specs=[
            # stream (t_tile, b_tile, H) slabs; T axis last -> accumulator axis
            pl.BlockSpec((t_tile, b_tile, H), lambda b, t: (t, b, 0)),
            # tiny constant weight: same block every step -> DMA'd once
            pl.BlockSpec((1, H), lambda b, t: (0, 0)),
        ],
        # lane-dense (b_tile, H) output tile, written once per batch block
        out_specs=pl.BlockSpec((b_tile, H), lambda b, t: (b, 0)),
        scratch_shapes=[
            pltpu.VMEM((b_tile, 1), jnp.float32),   # running max m
            pltpu.VMEM((b_tile, 1), jnp.float32),   # running denom l
            pltpu.VMEM((b_tile, H), jnp.float32),   # running weighted sum
        ],
        compiler_params=pltpu.CompilerParams(
            dimension_semantics=("parallel", "arbitrary"),
            vmem_limit_bytes=vmem_limit_bytes,
        ),
    )(x, w)
    return out[:B]


def temporal_attention_ref(x, w, bias):
    # plain-JAX reference mirroring the PyTorch forward exactly (incl. bias)
    scores = jnp.einsum("tbh,h->tb", x, w[0]) + bias[0]       # (T, B)
    weights = jax.nn.softmax(scores, axis=0)[:, :, None]      # (T, B, 1)
    return jnp.sum(weights * x, axis=0)                       # (B, H)


if __name__ == "__main__":
    # seq=8, batch=16, hidden=128: H fills the 128 lanes; the chosen batch
    # tile (8) fills the sublanes, grid has 2 parallel batch steps.
    T, B, H = 8, 16, 128

    key = jax.random.PRNGKey(0)
    kx, kw, kb = jax.random.split(key, 3)

    x = jax.random.normal(kx, (T, B, H), dtype=jnp.float32)
    # nn.Linear(hidden_dim, 1): weight (1, H), bias (1,) — deterministic init
    bound = 1.0 / (H ** 0.5)
    w = jax.random.uniform(kw, (1, H), dtype=jnp.float32, minval=-bound, maxval=bound)
    bias = jax.random.uniform(kb, (1,), dtype=jnp.float32, minval=-bound, maxval=bound)

    out = jax.block_until_ready(temporal_attention(x, w, bias))
    ref = temporal_attention_ref(x, w, bias)
    assert out.shape == (B, H)
    assert jnp.allclose(out, ref, atol=1e-5, rtol=1e-5), "mismatch vs reference"

    # exercise the padded-batch path (B not a multiple of the sublane tile)
    B2 = 10
    x2 = jax.random.normal(kx, (T, B2, H), dtype=jnp.float32)
    out2 = jax.block_until_ready(temporal_attention(x2, w, bias))
    ref2 = temporal_attention_ref(x2, w, bias)
    assert out2.shape == (B2, H)
    assert jnp.allclose(out2, ref2, atol=1e-5, rtol=1e-5), "mismatch vs reference (padded)"

    print("KERNEL_OK")
</pallas_src>

<mosaic_0001>
module attributes {stable_mosaic.version = 11 : i64} {
  func.func @temporal_attention_kernel(%arg0: i32, %arg1: i32, %arg2: memref<8x8x128xf32, #tpu.memory_space<vmem>>, %arg3: memref<1x128xf32, #tpu.memory_space<vmem>>, %arg4: memref<8x128xf32, #tpu.memory_space<vmem>>, %arg5: memref<8x1xf32, #tpu.memory_space<vmem>>, %arg6: memref<8x1xf32, #tpu.memory_space<vmem>>, %arg7: memref<8x128xf32, #tpu.memory_space<vmem>>) attributes {dimension_semantics = [#tpu.dimension_semantics<parallel>, #tpu.dimension_semantics<arbitrary>], iteration_bounds = array<i64: 2, 1>, scalar_prefetch = 0 : i64, scratch_operands = 3 : i64, tpu.core_type = #tpu.core_type<tc>, window_params = [{transform_indices = @transform_0, window_bounds = array<i64: 8, 8, 128>}, {pipeline_mode = #tpu.pipeline_mode<synchronous>, transform_indices = @transform_1, window_bounds = array<i64: 1, 128>}, {transform_indices = @transform_2, window_bounds = array<i64: 8, 128>}]} {
    %c0_i32 = arith.constant 0 : i32
    %0 = arith.cmpi eq, %arg1, %c0_i32 : i32
    %1 = arith.extui %0 : i1 to i32
    %c0_i32_0 = arith.constant 0 : i32
    %2 = arith.cmpi ne, %1, %c0_i32_0 : i32
    scf.if %2 {
      %cst_25 = arith.constant 0xFF800000 : f32
      %37 = vector.broadcast %cst_25 : f32 to vector<8x1xf32>
      %c0_26 = arith.constant 0 : index
      %c0_27 = arith.constant 0 : index
      %38 = vector.load %arg5[%c0_26, %c0_27] : memref<8x1xf32, #tpu.memory_space<vmem>>, vector<8x1xf32>
      tpu.vector_store %arg5[%c0_26, %c0_27], %37 {strides = array<i32>} : memref<8x1xf32, #tpu.memory_space<vmem>>, vector<8x1xf32>,
      %cst_28 = arith.constant 0.000000e+00 : f32
      %39 = vector.broadcast %cst_28 : f32 to vector<8x1xf32>
      %c0_29 = arith.constant 0 : index
      %c0_30 = arith.constant 0 : index
      %40 = vector.load %arg6[%c0_29, %c0_30] : memref<8x1xf32, #tpu.memory_space<vmem>>, vector<8x1xf32>
      tpu.vector_store %arg6[%c0_29, %c0_30], %39 {strides = array<i32>} : memref<8x1xf32, #tpu.memory_space<vmem>>, vector<8x1xf32>,
      %cst_31 = arith.constant 0.000000e+00 : f32
      %41 = vector.broadcast %cst_31 : f32 to vector<8x128xf32>
      %c0_32 = arith.constant 0 : index
      %c0_33 = arith.constant 0 : index
      %42 = vector.load %arg7[%c0_32, %c0_33] : memref<8x128xf32, #tpu.memory_space<vmem>>, vector<8x128xf32>
      tpu.vector_store %arg7[%c0_32, %c0_33], %41 {strides = array<i32>} : memref<8x128xf32, #tpu.memory_space<vmem>>, vector<8x128xf32>,
    } else {
    }
    %c0 = arith.constant 0 : index
    %c0_1 = arith.constant 0 : index
    %3 = vector.load %arg3[%c0, %c0_1] : memref<1x128xf32, #tpu.memory_space<vmem>>, vector<1x128xf32>
    %c0_2 = arith.constant 0 : index
    %c0_3 = arith.constant 0 : index
    %c0_4 = arith.constant 0 : index
    %4 = vector.load %arg2[%c0_2, %c0_3, %c0_4] : memref<8x8x128xf32, #tpu.memory_space<vmem>>, vector<8x8x128xf32>
    %5 = vector.shape_cast %3 : vector<1x128xf32> to vector<1x1x128xf32>
    %6 = vector.broadcast %5 : vector<1x1x128xf32> to vector<8x8x128xf32>
    %7 = arith.mulf %4, %6 : vector<8x8x128xf32>
    %cst = arith.constant dense<0.000000e+00> : vector<8x8xf32>
    %8 = vector.multi_reduction <add>, %7, %cst [2] : vector<8x8x128xf32> to vector<8x8xf32>
    %9 = vector.shape_cast %8 : vector<8x8xf32> to vector<8x8x1xf32>
    %c0_5 = arith.constant 0 : index
    %c0_6 = arith.constant 0 : index
    %10 = vector.load %arg5[%c0_5, %c0_6] : memref<8x1xf32, #tpu.memory_space<vmem>>, vector<8x1xf32>
    %cst_7 = arith.constant dense<0xFF800000> : vector<8x1xf32>
    %11 = vector.multi_reduction <maximumf>, %9, %cst_7 [0] : vector<8x8x1xf32> to vector<8x1xf32>
    %12 = arith.maximumf %10, %11 : vector<8x1xf32>
    %13 = arith.subf %10, %12 : vector<8x1xf32>
    %14 = math.exp %13 : vector<8x1xf32>
    %15 = vector.shape_cast %12 : vector<8x1xf32> to vector<1x8x1xf32>
    %16 = vector.broadcast %15 : vector<1x8x1xf32> to vector<8x8x1xf32>
    %17 = arith.subf %9, %16 : vector<8x8x1xf32>
    %18 = math.exp %17 : vector<8x8x1xf32>
    %c0_8 = arith.constant 0 : index
    %c0_9 = arith.constant 0 : index
    %19 = vector.load %arg6[%c0_8, %c0_9] : memref<8x1xf32, #tpu.memory_space<vmem>>, vector<8x1xf32>
    %20 = arith.mulf %14, %19 : vector<8x1xf32>
    %cst_10 = arith.constant dense<0.000000e+00> : vector<8x1xf32>
    %21 = vector.multi_reduction <add>, %18, %cst_10 [0] : vector<8x8x1xf32> to vector<8x1xf32>
    %22 = arith.addf %20, %21 : vector<8x1xf32>
    %c0_11 = arith.constant 0 : index
    %c0_12 = arith.constant 0 : index
    %23 = vector.load %arg6[%c0_11, %c0_12] : memref<8x1xf32, #tpu.memory_space<vmem>>, vector<8x1xf32>
    tpu.vector_store %arg6[%c0_11, %c0_12], %22 {strides = array<i32>} : memref<8x1xf32, #tpu.memory_space<vmem>>, vector<8x1xf32>,
    %c0_13 = arith.constant 0 : index
    %c0_14 = arith.constant 0 : index
    %24 = vector.load %arg7[%c0_13, %c0_14] : memref<8x128xf32, #tpu.memory_space<vmem>>, vector<8x128xf32>
    %25 = vector.broadcast %14 : vector<8x1xf32> to vector<8x128xf32>
    %26 = arith.mulf %25, %24 : vector<8x128xf32>
    %c0_15 = arith.constant 0 : index
    %c0_16 = arith.constant 0 : index
    %c0_17 = arith.constant 0 : index
    %27 = vector.load %arg2[%c0_15, %c0_16, %c0_17] : memref<8x8x128xf32, #tpu.memory_space<vmem>>, vector<8x8x128xf32>
    %28 = vector.broadcast %18 : vector<8x8x1xf32> to vector<8x8x128xf32>
    %29 = arith.mulf %28, %27 : vector<8x8x128xf32>
    %cst_18 = arith.constant dense<0.000000e+00> : vector<8x128xf32>
    %30 = vector.multi_reduction <add>, %29, %cst_18 [0] : vector<8x8x128xf32> to vector<8x128xf32>
    %31 = arith.addf %26, %30 : vector<8x128xf32>
    %c0_19 = arith.constant 0 : index
    %c0_20 = arith.constant 0 : index
    %32 = vector.load %arg7[%c0_19, %c0_20] : memref<8x128xf32, #tpu.memory_space<vmem>>, vector<8x128xf32>
    tpu.vector_store %arg7[%c0_19, %c0_20], %31 {strides = array<i32>} : memref<8x128xf32, #tpu.memory_space<vmem>>, vector<8x128xf32>,
    %c0_21 = arith.constant 0 : index
    %c0_22 = arith.constant 0 : index
    %33 = vector.load %arg5[%c0_21, %c0_22] : memref<8x1xf32, #tpu.memory_space<vmem>>, vector<8x1xf32>
    tpu.vector_store %arg5[%c0_21, %c0_22], %12 {strides = array<i32>} : memref<8x1xf32, #tpu.memory_space<vmem>>, vector<8x1xf32>,
    %c0_i32_23 = arith.constant 0 : i32
    %34 = arith.cmpi eq, %arg1, %c0_i32_23 : i32
    %35 = arith.extui %34 : i1 to i32
    %c0_i32_24 = arith.constant 0 : i32
    %36 = arith.cmpi ne, %35, %c0_i32_24 : i32
    scf.if %36 {
      %c0_25 = arith.constant 0 : index
      %c0_26 = arith.constant 0 : index
      %37 = vector.load %arg7[%c0_25, %c0_26] : memref<8x128xf32, #tpu.memory_space<vmem>>, vector<8x128xf32>
      %c0_27 = arith.constant 0 : index
      %c0_28 = arith.constant 0 : index
      %38 = vector.load %arg6[%c0_27, %c0_28] : memref<8x1xf32, #tpu.memory_space<vmem>>, vector<8x1xf32>
      %39 = vector.broadcast %38 : vector<8x1xf32> to vector<8x128xf32>
      %40 = arith.divf %37, %39 : vector<8x128xf32>
      %c0_29 = arith.constant 0 : index
      %c0_30 = arith.constant 0 : index
      %41 = vector.load %arg4[%c0_29, %c0_30] : memref<8x128xf32, #tpu.memory_space<vmem>>, vector<8x128xf32>
      tpu.vector_store %arg4[%c0_29, %c0_30], %40 {strides = array<i32>} : memref<8x128xf32, #tpu.memory_space<vmem>>, vector<8x128xf32>,
    } else {
    }
    return
  }
  func.func @transform_0(%arg0: i32, %arg1: i32) -> (i32, i32, i32) {
    %c0_i32 = arith.constant 0 : i32
    %c0_i32_0 = arith.constant 0 : i32
    return %arg1, %arg0, %c0_i32 : i32, i32, i32
  }
  func.func @transform_1(%arg0: i32, %arg1: i32) -> (i32, i32) {
    %c0_i32 = arith.constant 0 : i32
    %c0_i32_0 = arith.constant 0 : i32
    %c0_i32_1 = arith.constant 0 : i32
    return %c0_i32, %c0_i32_0 : i32, i32
  }
  func.func @transform_2(%arg0: i32, %arg1: i32) -> (i32, i32) {
    %c0_i32 = arith.constant 0 : i32
    %c0_i32_0 = arith.constant 0 : i32
    return %arg0, %c0_i32 : i32, i32
  }
}

</mosaic_0001>

<bundles_post_ra>
// kernel: tpu_custom_call.1
= control target key start
LH: loop header
LB: loop body
LE: loop exit
PB: predicated region body
PF: predicated region fallthrough
CT: control target
= control target key end

     0   :  { %s985_s0 = inlined_call_operand.hbm [shape: f32[8,16,128], index: 0, kind: input, shape index: {}]   ;;  %s986_s1 = inlined_call_operand.hbm [shape: f32[1,128], index: 1, kind: input, shape index: {}]   ;;  %s987_s2 = inlined_call_operand.hbm [shape: f32[16,128], index: 2, kind: output, shape index: {}]  }
   0x1   :  { %988 = sst [smem:[#allocation14_spill]] %s986_s1 }
   0x2   :  { %7 = vsyncpa [#allocation6], 0 }
   0x3   :  { %9 = vsyncpa [#allocation6 + $0x1], 0 }
   0x4   :  { %10 = vsyncpa [#allocation9], 0 }
   0x5   :  { %11 = vsyncpa [#allocation7], 0 }
   0x6   :  { %13 = vsyncpa [#allocation7 + $0x1], 0  ;;  %s789_s9 = smov 0   ;;  %s791_s10 = smov 0  }
   0x7   :  { %s793_s11 = smov 0   ;;  %s795_s12 = smov 0  }
   0x8   :  { %s797_s13 = smov 0   ;;  %s799_s14 = smov 0  }
   0x9 LB: > { %s501_s15 = sadd.s32 4294967295, %s765_s14   ;;  %s502_s16 = sadd.s32 4294967294, %s765_s14   ;;  %s765_s14 = sphi %s799_s14, %s19_s14   ;;  %s761_s13 = sphi %s797_s13, %s1001_s13   ;;  %s757_s12 = sphi %s795_s12, %s1000_s12   ;;  %s753_s11 = sphi %s793_s11, %s999_s11   ;;  %s749_s10 = sphi %s791_s10, %s998_s10   ;;  %s745_s9 = sphi %s789_s9, %s997_s9  }
   0xa   : > { %s40_s17 = sadd.s32 1, %s753_s11  ;;  %p47_p0 = scmp.ne.s32.totalorder %s753_s11, %s749_s10 }
   0xb   : > { %p48_p1 = scmp.eq.s32.totalorder %s765_s14, 0  ;;  %p53_p2 = scmp.ne.s32.totalorder %s749_s10, %s745_s9 }
   0xc   : > { %p827_p3 = scmp.eq.s32.totalorder %s501_s15, 0  ;;  %p98_p4 = scmp.eq.s32.totalorder %s501_s15, 1 }
   0xd   : > { %p831_p5 = por %p48_p1, %p47_p0  ;;  %p104_p6 = scmp.eq.s32.totalorder %s502_s16, 1 }
   0xe   : > { %p837_p7 = por %p827_p3, %p53_p2  ;;  %p841_p8 = por %p98_p4, %p47_p0 }
   0xf   : > { %p845_p9 = por %p104_p6, %p53_p2  ;;  %p503_p10 = scmp.ge.s32.totalorder %s765_s14, 1 }
  0x10   : > { %p111_p11 = scmp.lt.s32.totalorder %s765_s14, 3  ;;  %s994_s1 = sld [smem:[#allocation14_spill]] }
  0x11   : > { %s767_s27 = smov [#allocation8]   ;;  %p505_p13 = scmp.ge.s32.totalorder %s765_s14, 2 }
  0x12   : > { %p854_p12 = pnand %p503_p10, %p111_p11  ;;  %s125_s28 = sshll.u32 %s767_s27, 4  ;;  %s126_s28 = int_to_ptr.vmem [resolvable:$true] %s125_s28 }
  0x13   : > { %p537_p1 = scmp.lt.s32.totalorder %s765_s14, 2  ;;  %s31_s30 = sadd.s32 1, %s761_s13 }
  0x14   : > { %p524_p0 = pneg %p854_p12  ;;  %p33_p6 = scmp.ge.s32.totalorder %s31_s30, 2 }
  0x15   : > { %p866_p4 = pnand %p537_p1, %p831_p5  ;;  %s136_s3 = sand.u32 1, %s753_s11  }
  0x16   : > { %s123_s25 = sshll.u32 %s994_s1, 4  ;;  %p525_p2 = pnand %p524_p0, %p827_p3  ;;  %s124_s25 = int_to_ptr.hbm [resolvable:$true] %s123_s25 }
  0x17   : > { %s1003_s30 = smov (%p33_p6, %s31_s30), 0  ;;  %s506_s4 = sshll.u32 %s136_s3, 6 }
  0x18   : > { %527 = dma.hbm_to_vmem [thread:$0]  (!%p525_p2), %s124_s25, 16, %s126_s28, [#allocation9]  }
  0x19   : > { %s36_s5 = ssub.s32 %s761_s13, %s1003_s30  ;;  %s507_s6 = sshll.u32 %s761_s13, 3 }
  0x1a   : > { %p38_p10 = scmp.eq.s32.totalorder %s36_s5, 0  ;;  %s147_s15 = scalar_lea.hbm %s985_s0, %s507_s6 }
  0x1b   : > { %s140_s16 = scalar_lea.vmem [#allocation5], %s506_s4  ;;  %s148_s24 = sshll.u32 %s147_s15, 4  ;;  %s149_s24 = int_to_ptr.hbm [resolvable:$true] %s148_s24 }
  0x1c   : > { %s150_s19 = sshll.u32 %s140_s16, 4  ;;  %s137_s25 = scalar_lea.sflag [#allocation6], %s136_s3  ;;  %s151_s19 = int_to_ptr.vmem [resolvable:$true] %s150_s19 }
  0x1d   : > { %s883_s23 = scalar_select %p38_p10, %s753_s11, %s40_s17  }
  0x1e   : > { %s768_s27 = smov 256   ;;  %s769_s28 = smov 128  }
  0x1f   : > { %s770_s1 = smov 8   ;;  %162 = sbr.rel (%p854_p12) target bundleno = 343 (0x157), region = 28 }
  0x20   : > { %531 = dma.hbm_to_vmem [thread:$0]  (!%p866_p4), %s149_s24, 1024, %s151_s19, %s137_s25, %s768_s27, %s769_s28, %s770_s1  }
  0x21   : > { %s890_s5 = sand.u32 (!%p854_p12), 1, %s749_s10  }
  0x22   : > { %s509_s17 = sshll.u32 (!%p854_p12), %s890_s5, 6  ;;  %s165_s4 = scalar_lea.sflag (!%p854_p12), [#allocation6], %s890_s5 }
  0x23   : > { %s168_s6 = scalar_lea.vmem (!%p854_p12), [#allocation5], %s509_s17 }
  0x24   : > { %732 = dma.done.wait (%p837_p7), %s165_s4, 1024  }
  0x25   : > { %734 = vsyncadd (%p837_p7), %s165_s4, 4294966272 }
  0x26   : > { %736 = dma.done.wait (%p827_p3), [#allocation9], 16  }
  0x27   : > { %738 = vsyncadd (%p827_p3), [#allocation9], 4294967280  ;;  %v902_v0 = vld [vmem:[%s168_s6 + $0x20] sm:$0xff]  ;;  %v904_v2 = vld [vmem:[%s168_s6 + $0x10] sm:$0xff]  ;;  %vm200_vm0 = vcmask 7168   ;;  %v771_v17 = vmov -inf  }
  0x28   : > { %v598_v1 = vld [vmem:[#allocation8] ss:$0 sm:$0xff]  ;;  %v911_v7 = vld [vmem:[%s168_s6 + $0x28] sm:$0xff]  ;;  %v913_v8 = vld [vmem:[%s168_s6 + $0x18] sm:$0xff]  ;;  %201 = vst.msk [vmem:[#allocation2] sm:$0xff] %vm200_vm0, %v771_v17  ;;  %v772_v18 = vmov 0.0  }
  0x29   : > { %v906_v3 = vld [vmem:[%s168_s6] sm:$0xff]  ;;  %v220_v4 = vmul.f32 %v598_v1, %v902_v0  ;;  %v218_v5 = vmul.f32 %v598_v1, %v904_v2  ;;  %v915_v9 = vld [vmem:[%s168_s6 + $0x8] sm:$0xff]  ;;  %v221_v10 = vmul.f32 %v598_v1, %v911_v7  ;;  %v219_v11 = vmul.f32 %v598_v1, %v913_v8  ;;  %v920_v13 = vld [vmem:[%s168_s6 + $0x38] sm:$0xff]  ;;  %202 = vst.msk [vmem:[#allocation3] sm:$0xff] %vm200_vm0, %v772_v18  ;;  %s511_s1 = sshll.u32 %s890_s5, 3  ;;  %s513_s18 = sshll.u32 %s757_s12, 3 }
  0x2a   : > { %v216_v6 = vmul.f32 %v598_v1, %v906_v3  ;;  %v217_v12 = vmul.f32 %v598_v1, %v915_v9  ;;  %v922_v14 = vld [vmem:[%s168_s6 + $0x30] sm:$0xff]  ;;  %v223_v15 = vmul.f32 %v598_v1, %v920_v13  ;;  %v773_v24 = vmov 0   ;;  %s406_s29 = scalar_lea.hbm %s987_s2, %s513_s18  ;;  %s194_s12 = scalar_lea.vmem [#allocation10], %s511_s1 }
  0x2b   : > { %232 = vadd.xlane.f32.xlu2 %v220_v4  ;;  %228 = vadd.xlane.f32.xlu1 %v218_v5  ;;  %v222_v16 = vmul.f32 %v598_v1, %v922_v14  ;;  %s408_s3 = sshll.u32 %s194_s12, 4  ;;  %s410_s7 = sshll.u32 %s406_s29, 4  ;;  %s409_s3 = int_to_ptr.vmem [resolvable:$true] %s408_s3  ;;  %s411_s7 = int_to_ptr.hbm [resolvable:$true] %s410_s7 }
  0x2c   : > { %224 = vadd.xlane.f32.xlu0 %v216_v6  ;;  %597 = vset.pattern.permute.xlu1 %v773_v24  ;;  %s396_s8 = scalar_lea.sflag [#allocation7], %s890_s5  ;;  %s693_s15 = sshra.s32 %s411_s7, 4  ;;  %s694_s15 = int_to_ptr.hbm [resolvable:$true] %s693_s15 }
  0x2d   : > { %596 = vset.pattern.permute.xlu0 %v773_v24  ;;  %595 = vset.pattern.permute.xlu2 %v773_v24  ;;  %s695_s16 = scalar_lea.hbm %s694_s15, 8  ;;  %s699_s25 = scalar_lea.hbm %s987_s2, 16 }
  0x2e   : > { %p696_p3 = scmp.ne.s32.totalorder %s694_s15, %s695_s16  ;;  %p700_p11 = scmp.lt.s32.totalorder %s694_s15, %s987_s2 }
  0x2f   : > { %v240_v34 = vld [vmem:[#allocation2] sm:$0xff]  ;;  %p701_p12 = scmp.lt.s32.totalorder %s699_s25, %s695_s16 }
  0x30   : > { %p697_p5 = pnand %p696_p3, %p841_p8 }
  0x31   : > { %p702_p0 = por %p701_p12, %p700_p11 }
  0x32   : > { %p698_p7 = pneg %p697_p5 }
  0x33   : > { %234 = vadd.xlane.f32.xlu2 %v221_v10  ;;  %230 = vadd.xlane.f32.xlu1 %v219_v11 }
  0x34   : > { %226 = vadd.xlane.f32.xlu0 %v217_v12  ;;  %p703_p1 = pnand %p702_p0, %p698_p7 }
  0x3b   : > { %238 = vadd.xlane.f32.xlu1 %v223_v15 }
  0x3c   : > { %236 = vadd.xlane.f32.xlu0 %v222_v16 }
  0x9e   : > { %v229_v19 = vpop.xlane.xlu1 %228  ;;  %v233_v21 = vpop.xlane.xlu2 %232 }
  0x9f   : > { %v225_v20 = vpop.xlane.xlu0 %224 }
  0xa0   : > { %v241_v30 = vmax.f32 %v225_v20, %v233_v21 }
  0xa6   : > { %v231_v22 = vpop.xlane.xlu1 %230  ;;  %v235_v25 = vpop.xlane.xlu2 %234 }
  0xa7   : > { %v227_v23 = vpop.xlane.xlu0 %226 }
  0xa8   : > { %v242_v26 = vmax.f32 %v227_v23, %v235_v25 }
  0xaa   : > { %v245_v32 = vmax.f32 %v241_v30, %v242_v26 }
  0xae   : > { %v239_v27 = vpop.xlane.xlu1 %238 }
  0xaf   : > { %v244_v28 = vmax.f32 %v231_v22, %v239_v27  ;;  %v237_v29 = vpop.xlane.xlu0 %236 }
  0xb0   : > { %v243_v31 = vmax.f32 %v229_v19, %v237_v29 }
  0xb2   : > { %v246_v33 = vmax.f32 %v243_v31, %v244_v28 }
  0xb4   : > { %v247_v35 = vmax.f32 %v245_v32, %v246_v33 }
  0xb6   : > { %v248_v36 = vmax.f32 %v240_v34, %v247_v35 }
  0xb8   : > { %v249_v37 = vsub.f32 %v240_v34, %v248_v36  ;;  %v252_v38 = vsub.f32 %v225_v20, %v248_v36  ;;  %v253_v39 = vsub.f32 %v227_v23, %v248_v36  ;;  %v254_v40 = vsub.f32 %v229_v19, %v248_v36  ;;  %368 = vst.msk [vmem:[#allocation2] sm:$0xff] %vm200_vm0, %v248_v36  ;;  %v276_v19 = vld [vmem:[#allocation3] sm:$0xff] }
  0xb9   : > { %v255_v41 = vsub.f32 %v231_v22, %v248_v36  ;;  %v256_v43 = vsub.f32 %v233_v21, %v248_v36  ;;  %v257_v47 = vsub.f32 %v235_v25, %v248_v36  ;;  %v258_v49 = vsub.f32 %v237_v29, %v248_v36 }
  0xba   : > { %v250_v42 = vmul.f32 1.442695, %v249_v37  ;;  %v260_v44 = vmul.f32 1.442695, %v252_v38  ;;  %v262_v45 = vmul.f32 1.442695, %v253_v39  ;;  %v259_v51 = vsub.f32 %v239_v27, %v248_v36 }
  0xbb   : > { %v264_v46 = vmul.f32 1.442695, %v254_v40  ;;  %v266_v48 = vmul.f32 1.442695, %v255_v41  ;;  %v268_v50 = vmul.f32 1.442695, %v256_v43 }
  0xbc   : > { %599 = vpow2.f32 %v250_v42  ;;  %v270_v52 = vmul.f32 1.442695, %v257_v47  ;;  %v272_v53 = vmul.f32 1.442695, %v258_v49  ;;  %v274_v57 = vmul.f32 1.442695, %v259_v51 }
  0xbd   : > { %601 = vpow2.f32 %v260_v44 }
  0xbe   : > { %603 = vpow2.f32 %v262_v45 }
  0xbf   : > { %605 = vpow2.f32 %v264_v46 }
  0xc0   : > { %607 = vpow2.f32 %v266_v48 }
  0xc1   : > { %609 = vpow2.f32 %v268_v50 }
  0xc2   : > { %v600_v54 = vpop.eup %599  ;;  %611 = vpow2.f32 %v270_v52 }
  0xc3   : > { %v602_v55 = vpop.eup %601  ;;  %299 = vperm.xlu2 %595, %v600_v54   ;;  %613 = vpow2.f32 %v272_v53  ;;  %v277_v23 = vmul.f32 %v600_v54, %v276_v19 }
  0xc4   : > { %v604_v56 = vpop.eup %603  ;;  %v279_v58 = vsel %vm200_vm0, %v602_v55, 0.0  ;;  %313 = vperm.xlu0 %596, %v602_v55   ;;  %615 = vpow2.f32 %v274_v57 }
  0xc5   : > { %v606_v59 = vpop.eup %605  ;;  %v280_v60 = vsel %vm200_vm0, %v604_v56, 0.0  ;;  %318 = vperm.xlu1 %597, %v604_v56  }
  0xc6   : > { %v608_v61 = vpop.eup %607  ;;  %v281_v62 = vadd.f32 %v280_v60, %v279_v58  ;;  %v282_v63 = vsel %vm200_vm0, %v606_v59, 0.0 }
  0xc7   : > { %v610_v1 = vpop.eup %609  ;;  %v284_v5 = vsel %vm200_vm0, %v608_v61, 0.0 }
  0xc8   : > { %v283_v4 = vadd.f32 %v282_v63, %v281_v62  ;;  %v612_v6 = vpop.eup %611  ;;  %v286_v12 = vsel %vm200_vm0, %v610_v1, 0.0 }
  0xc9   : > { %v614_v11 = vpop.eup %613  ;;  %v288_v16 = vsel %vm200_vm0, %v612_v6, 0.0 }
  0xca   : > { %v285_v10 = vadd.f32 %v284_v5, %v283_v4  ;;  %v616_v17 = vpop.eup %615  ;;  %v290_v20 = vsel %vm200_vm0, %v614_v11, 0.0 }
  0xcb   : > { %323 = vperm.xlu2 %595, %v606_v59   ;;  %v292_v22 = vsel %vm200_vm0, %v616_v17, 0.0 }
  0xcc   : > { %v287_v15 = vadd.f32 %v286_v12, %v285_v10  ;;  %343 = vperm.xlu0 %596, %v614_v11  }
  0xcd   : > { %328 = vperm.xlu1 %597, %v608_v61  }
  0xce   : > { %v289_v18 = vadd.f32 %v288_v16, %v287_v15 }
  0xd0   : > { %v291_v21 = vadd.f32 %v290_v20, %v289_v18 }
  0xd2   : > { %v293_v24 = vadd.f32 %v292_v22, %v291_v21 }
  0xd4   : > { %v294_v25 = vadd.f32 %v293_v24, %v277_v23 }
  0xd5   : > { %338 = vperm.xlu1 %597, %v612_v6  }
  0xd6   : > { %295 = vst.msk [vmem:[#allocation3] sm:$0xff] %vm200_vm0, %v294_v25 }
  0xdd   : > { %v373_v26 = vld [vmem:[#allocation3] sm:$0xff] }
  0xde   : > { %376 = vperm.xlu2 %595, %v373_v26  }
  0xe6   : > { %333 = vperm.xlu2 %595, %v610_v1  }
  0xee   : > { %348 = vperm.xlu2 %595, %v616_v17  }
 0x11d   : > { %v300_v27 = vpop.permute.xlu2 %299 }
 0x125   : > { %v324_v28 = vpop.permute.xlu2 %323 }
 0x126   : > { %v353_v37 = vmul.f32 %v324_v28, %v904_v2 }
 0x136   : > { %v314_v30 = vpop.permute.xlu0 %313 }
 0x137   : > { %v319_v29 = vpop.permute.xlu1 %318  ;;  %v351_v33 = vmul.f32 %v314_v30, %v906_v3 }
 0x138   : > { %v377_v31 = vpop.permute.xlu2 %376  ;;  %v352_v32 = vmul.f32 %v319_v29, %v915_v9 }
 0x139   : > { %617 = vrcp.f32 %v377_v31  ;;  %v390_v50 = vand.u32 2147483648, %v377_v31  ;;  %vm384_vm2 = vweird.f32 %v377_v31  ;;  %v388_v51 = vand.u32 2147483647, %v377_v31 }
 0x13a   : > { %v359_v34 = vadd.f32 %v352_v32, %v351_v33 }
 0x13b   : > { %v391_v55 = vor.u32 1.1754944e-38, %v390_v50  ;;  %vm389_vm4 = vcmp.eq.f32.partialorder %v388_v51, 8.507059e+37 }
 0x13c   : > { %v360_v42 = vadd.f32 %v359_v34, %v353_v37 }
 0x13e   : > { %v344_v9 = vpop.permute.xlu0 %343 }
 0x13f   : > { %v618_v35 = vpop.eup %617  ;;  %v329_v36 = vpop.permute.xlu1 %328  ;;  %v357_v2 = vmul.f32 %v344_v9, %v922_v14 }
 0x140   : > { %v380_v38 = vmul.f32 %v618_v35, %v377_v31  ;;  %v354_v39 = vmul.f32 %v329_v36, %v913_v8  ;;  %v334_v40 = vpop.permute.xlu2 %333  ;;  %vm385_vm1 = vweird.f32 %v618_v35 }
 0x141   : > { %v355_v44 = vmul.f32 %v334_v40, %v902_v0  ;;  %vm386_vm3 = vmor %vm384_vm2, %vm385_vm1 }
 0x142   : > { %v381_v41 = vsub.f32 1.0, %v380_v38  ;;  %v361_v43 = vadd.f32 %v360_v42, %v354_v39 }
 0x144   : > { %v382_v45 = vmul.f32 %v618_v35, %v381_v41  ;;  %v362_v3 = vadd.f32 %v361_v43, %v355_v44 }
 0x146   : > { %v383_v49 = vadd.f32 %v618_v35, %v382_v45 }
 0x147   : > { %v339_v46 = vpop.permute.xlu1 %338 }
 0x148   : > { %v356_v47 = vmul.f32 %v339_v46, %v911_v7  ;;  %v349_v48 = vpop.permute.xlu2 %348  ;;  %v302_v7 = vmul.f32 0.0, %v300_v27  ;;  %v387_v53 = vsel %vm386_vm3, %v618_v35, %v383_v49 }
 0x149   : > { %v358_v0 = vmul.f32 %v349_v48, %v920_v13  ;;  %v392_v56 = vsel %vm389_vm4, %v391_v55, %v387_v53 }
 0x14a   : > { %v363_v8 = vadd.f32 %v362_v3, %v356_v47 }
 0x14c   : > { %v364_v52 = vadd.f32 %v363_v8, %v357_v2 }
 0x14e   : > { %v365_v54 = vadd.f32 %v364_v52, %v358_v0 }
 0x150   : > { %v366_v14 = vadd.f32 %v365_v54, %v302_v7 }
 0x152   : > { %v393_v57 = vmul.f32 %v392_v56, %v366_v14 }
 0x154   : > { %394 = vst [vmem:[%s194_s12] sm:$0xff] %v393_v57 }
 0x155   : > { %706 = shalt.err (!%p703_p1)
}
 0x156   : > { %522 = dma.vmem_to_hbm [thread:$0]  (%p841_p8), %s409_s3, 128, %s411_s7, %s396_s8  }
 0x157 PF: > { %s422_s5 = sand.u32 1, %s745_s9   ;;  %p533_p2 = pnand %p505_p13, %p845_p9 }
 0x158   : > { %s423_s17 = scalar_lea.sflag [#allocation7], %s422_s5 }
 0x159   : > { %p534_p4 = pneg %p533_p2 }
 0x15b   : > { %740 = dma.done.wait (%p534_p4), %s423_s17, 128  }
 0x15c   : > { %742 = vsyncadd (%p534_p4), %s423_s17, 4294967168  ;;  %s19_s14 = sadd.s32 1, %s765_s14   ;;  %s997_s9 = smov %s749_s10 }
 0x15d   : > { %p16_p6 = scmp.ge.s32.totalorder %s19_s14, 4   ;;  %s998_s10 = smov %s753_s11 }
 0x15e   : > { %s999_s11 = smov %s883_s23  ;;  %s1000_s12 = smov %s761_s13 }
 0x15f   : > { %s1001_s13 = smov %s1003_s30  ;;  %18 = sbr.rel (!%p16_p6) target bundleno = 9 (0x9), region = 85 }
 0x164   :  { %429 = vsyncpa [#allocation6], 1 }
 0x165   :  { %431 = vsyncpa [#allocation6 + $0x1], 1 }
 0x166   :  { %432 = vsyncpa [#allocation9], 1 }
 0x167   :  { %433 = vsyncpa [#allocation7], 1 }
 0x168   :  { %435 = vsyncpa [#allocation7 + $0x1], 1 }

</bundles_post_ra>
